<compile_context>
chip_gen: v7x
topology: tpu7x:2x2x1
jax: 0.10.0
libtpu: 0.0.40
codegen_flags: <defaults>
</compile_context>

<pallas_src>
import functools
import math

import jax
import jax.numpy as jnp
from jax import lax
from jax.experimental import pallas as pl
from jax.experimental.pallas import tpu as pltpu

LN_EPS = 1e-5

_PARAM_ORDER = ("g1", "be1", "w1t", "b1", "w2t", "b2", "a1",
                "g2", "be2", "w3t", "b3", "w4t", "b4", "a2")
_BIG_WEIGHTS = ("w1t", "w2t", "w3t", "w4t")


def _gelu_exact(x):
    # matches torch.nn.GELU() default (erf formulation)
    return 0.5 * x * (1.0 + lax.erf(x * (1.0 / math.sqrt(2.0))))


def _layernorm_lastdim(x, gamma, beta):
    # two-pass LN (centered variance) - avoids E[x^2]-E[x]^2 cancellation
    mu = jnp.mean(x, axis=-1, keepdims=True)
    xc = x - mu
    var = jnp.mean(xc * xc, axis=-1, keepdims=True)
    return xc * lax.rsqrt(var + LN_EPS) * gamma + beta


def _mlp2d(rows_bf16, w_in_ref, b_in, w_out_ref, b_out, h_chunk):
    """(R, K) bf16 -> gelu(rows @ w_in + b_in) @ w_out + b_out, f32 out.

    The hidden dim is processed in `h_chunk`-wide slices so the (R, H) f32
    intermediate never has to materialize at full width (bounds vreg / VMEM
    pressure for large H)."""
    H = w_in_ref.shape[-1]
    R = rows_bf16.shape[0]
    N = w_out_ref.shape[-1]
    acc = jnp.zeros((R, N), jnp.float32)
    for c0 in range(0, H, h_chunk):
        c1 = min(c0 + h_chunk, H)
        h = _gelu_exact(
            jnp.dot(rows_bf16, w_in_ref[0, :, c0:c1],
                    preferred_element_type=jnp.float32) + b_in[:, c0:c1])
        acc = acc + jnp.dot(h.astype(jnp.bfloat16), w_out_ref[0, c0:c1, :],
                            preferred_element_type=jnp.float32)
    return acc + b_out


def _mixer_kernel(h_chunk,
                  x_ref,
                  g1_ref, be1_ref, w1t_ref, b1_ref, w2t_ref, b2_ref, a1_ref,
                  g2_ref, be2_ref, w3t_ref, b3_ref, w4t_ref, b4_ref, a2_ref,
                  o_ref):
    """One grid step = MixerBlock `d` applied to the resident (Bt, C, T) slab
    held in o_ref (f32 accumulator across the depth axis)."""
    d = pl.program_id(1)
    f32, bf16 = jnp.float32, jnp.bfloat16
    Bt, C, T = o_ref.shape

    @pl.when(d == 0)
    def _():
        o_ref[...] = x_ref[...].astype(f32)

    x = o_ref[...]                                               # (Bt, C, T) f32

    # ---- token mixer: x += a1 * (LN -> transpose -> (C->H->C) MLP -> transpose)
    xn = _layernorm_lastdim(x, g1_ref[d], be1_ref[d])            # (Bt, C, T)
    xt = jnp.swapaxes(xn, 1, 2).reshape(Bt * T, C).astype(bf16)  # one slab relayout
    tm = _mlp2d(xt, w1t_ref, b1_ref[d], w2t_ref, b2_ref[d], h_chunk)  # (Bt*T, C)
    # TODO(synk): nn.Dropout skipped (identity / eval-mode forward semantics).
    x = x + a1_ref[d] * jnp.swapaxes(tm.reshape(Bt, T, C), 1, 2)

    # ---- channel mixer: x += a2 * (LN -> (T->H->T) MLP)
    xn2 = _layernorm_lastdim(x, g2_ref[d], be2_ref[d])           # (Bt, C, T)
    xc = xn2.reshape(Bt * C, T).astype(bf16)
    cm = _mlp2d(xc, w3t_ref, b3_ref[d], w4t_ref, b4_ref[d], h_chunk)  # (Bt*C, T)
    o_ref[...] = x + a2_ref[d] * cm.reshape(Bt, C, T)


def _tpu_vmem_bytes():
    try:
        return int(pltpu.get_tpu_info().vmem_capacity_bytes)
    except Exception:
        return 64 * 1024 * 1024      # conservative (v7x per-TC) fallback


def _is_megacore():
    try:
        kind = jax.devices()[0].device_kind.lower()
    except Exception:
        return True                  # conservative: prefer >=2 batch blocks
    return ("v4" in kind) or ("v5p" in kind) or ("7" in kind)


def _pick_batch_tile(B, C, T, H, depth, h_chunk, vmem_cap, megacore):
    """Largest Bt (divisor of B) whose working set fits ~55% of per-core VMEM.
    Single-TC chips (v5e/v6e) prefer nb == 1 so weights are streamed from HBM
    only once; megacore chips (v4/v5p/v7x) prefer an even nb >= 2 so the
    'parallel' batch axis actually shards across both TensorCores."""
    weights_layer = 2 * (2 * H * (C + T))                  # bf16 bytes / layer
    small_resident = 4 * depth * (6 * T + 2 * C + 2 * H)   # resident f32 vectors
    fixed = 2 * weights_layer + small_resident             # 2x-buffered weights
    # per batch item: x in (2x buffered) + out (resident + writeback) f32 blocks
    # plus slab-wide LN / packed / accumulator temporaries and H-chunk slices.
    per_batch = (2 + 2) * C * T * 4 + 8 * C * T * 4 + 2 * max(C, T) * h_chunk * 4
    budget = int(0.55 * vmem_cap)
    bt_cap = max(1, (budget - fixed) // max(per_batch, 1))

    divisors = [b for b in range(1, B + 1) if B % b == 0]
    fitting = [b for b in divisors if b <= bt_cap] or [1]
    if megacore:
        even = [b for b in fitting if (B // b) >= 2 and (B // b) % 2 == 0]
        if even:
            return max(even)
    return max(fitting)


def mixer_mlp_forward(x, packed, *, donate_x=False):
    """Run the full MixerMLP stack (all depth layers) in one fused pallas_call."""
    B, C, T = x.shape
    orig_dtype = x.dtype
    depth = packed["g1"].shape[0]
    H = packed["w1t"].shape[-1]
    h_chunk = H if H <= 512 else 512

    vmem_cap = _tpu_vmem_bytes()
    megacore = _is_megacore()
    Bt = _pick_batch_tile(B, C, T, H, depth, h_chunk, vmem_cap, megacore)
    nb = B // Bt
    # TODO(synk): pad T to a multiple of 128 (with masked LN / zero-padded
    # w3t/w4t/a2) for lane-dense stores when token counts like 196 show up.

    params = [packed[k] for k in _PARAM_ORDER]

    xmap = lambda b, d: (b, 0, 0)          # x / out resident across depth axis
    wmap = lambda b, d: (d, 0, 0)          # stream layer d's big weights
    rmap = lambda b, d: (0, 0, 0)          # small vectors: fetched once, resident

    in_specs = [pl.BlockSpec((Bt, C, T), xmap)]
    for name, p in zip(_PARAM_ORDER, params):
        if name in _BIG_WEIGHTS:
            in_specs.append(pl.BlockSpec((1,) + tuple(p.shape[1:]), wmap))
        else:
            in_specs.append(pl.BlockSpec(tuple(p.shape), rmap))
    out_specs = pl.BlockSpec((Bt, C, T), xmap)

    # advisory cost estimate for the XLA scheduler
    bytes_weights = sum(int(packed[k].size) * packed[k].dtype.itemsize
                        for k in _BIG_WEIGHTS)
    bytes_small = sum(int(packed[k].size) * packed[k].dtype.itemsize
                      for k in _PARAM_ORDER if k not in _BIG_WEIGHTS)
    flops = 8 * B * C * T * H * depth
    transcendentals = depth * B * H * (T + C)
    bytes_accessed = 2 * B * C * T * 4 + nb * bytes_weights + bytes_small

    # explicit per-generation VMEM budget (re-derived for 64-MiB v7x cores)
    weights_layer_bytes = bytes_weights // max(depth, 1)
    vmem_est = (4 * Bt * C * T * 4                # x (2x) + out (2x) f32 blocks
                + 2 * weights_layer_bytes         # double-buffered bf16 weights
                + bytes_small                     # resident per-layer vectors
                + 8 * Bt * C * T * 4              # slab-wide temporaries
                + 2 * Bt * max(C, T) * h_chunk * 4)
    vmem_limit = int(min(0.85 * vmem_cap, max(48 * 1024 * 1024, 2 * vmem_est)))
    vmem_limit = max(vmem_limit, vmem_est + (4 << 20))

    xin = x.astype(jnp.float32)
    out = pl.pallas_call(
        functools.partial(_mixer_kernel, h_chunk),
        out_shape=jax.ShapeDtypeStruct((B, C, T), jnp.float32),
        grid_spec=pltpu.PrefetchScalarGridSpec(
            num_scalar_prefetch=0,
            grid=(nb, depth),
            in_specs=in_specs,
            out_specs=out_specs),
        compiler_params=pltpu.CompilerParams(
            dimension_semantics=("parallel", "arbitrary"),
            vmem_limit_bytes=vmem_limit),
        cost_estimate=pl.CostEstimate(flops=flops,
                                      transcendentals=transcendentals,
                                      bytes_accessed=bytes_accessed),
        # in-place only when the caller donates x (x is consumed).
        input_output_aliases=({0: 0} if donate_x else {}),
    )(xin, *params)
    return out.astype(orig_dtype)


def init_block_params(key, token, channel, hidden):
    """Per-block parameters in PyTorch layout."""
    ks = jax.random.split(key, 8)
    f32 = jnp.float32
    s = 0.05
    return {
        "ln1_g": jnp.ones((token,), f32), "ln1_b": jnp.zeros((token,), f32),
        "w1": s * jax.random.normal(ks[0], (hidden, channel), f32),   # Linear(C->H)
        "b1": s * jax.random.normal(ks[1], (hidden,), f32),
        "w2": s * jax.random.normal(ks[2], (channel, hidden), f32),   # Linear(H->C)
        "b2": s * jax.random.normal(ks[3], (channel,), f32),
        "a1": jnp.ones((token,), f32),
        "ln2_g": jnp.ones((token,), f32), "ln2_b": jnp.zeros((token,), f32),
        "w3": s * jax.random.normal(ks[4], (hidden, token), f32),     # Linear(T->H)
        "b3": s * jax.random.normal(ks[5], (hidden,), f32),
        "w4": s * jax.random.normal(ks[6], (token, hidden), f32),     # Linear(H->T)
        "b4": s * jax.random.normal(ks[7], (token,), f32),
        "a2": jnp.ones((token,), f32),
    }


def pack_params(blocks):
    """Stack per-layer params over a leading depth axis, in kernel layout
    (weights pre-transposed and cast to bf16, everything else f32)."""
    st = lambda k: jnp.stack([p[k] for p in blocks])
    bf16 = jnp.bfloat16
    return {
        "g1":  st("ln1_g")[:, None, :],                       # (D, 1, T)
        "be1": st("ln1_b")[:, None, :],
        "w1t": jnp.swapaxes(st("w1"), 1, 2).astype(bf16),     # (D, C, H)
        "b1":  st("b1")[:, None, :],                          # (D, 1, H)
        "w2t": jnp.swapaxes(st("w2"), 1, 2).astype(bf16),     # (D, H, C)
        "b2":  st("b2")[:, None, :],                          # (D, 1, C)
        "a1":  st("a1")[:, None, :],
        "g2":  st("ln2_g")[:, None, :],
        "be2": st("ln2_b")[:, None, :],
        "w3t": jnp.swapaxes(st("w3"), 1, 2).astype(bf16),     # (D, T, H)
        "b3":  st("b3")[:, None, :],                          # (D, 1, H)
        "w4t": jnp.swapaxes(st("w4"), 1, 2).astype(bf16),     # (D, H, T)
        "b4":  st("b4")[:, None, :],                          # (D, 1, T)
        "a2":  st("a2")[:, None, :],
    }


def _reference_forward(x, blocks):
    """Pure-JAX replica of MixerMLP.forward (dropout = identity), with the same
    bf16 matmul inputs / f32 accumulation precision the kernel uses."""
    def ln(v, g, b):
        mu = jnp.mean(v, -1, keepdims=True)
        var = jnp.mean((v - mu) ** 2, -1, keepdims=True)
        return (v - mu) / jnp.sqrt(var + LN_EPS) * g + b

    def lin(a, w, b):  # a @ w.T + b
        y = jnp.einsum("...i,oi->...o", a.astype(jnp.bfloat16),
                       w.astype(jnp.bfloat16),
                       preferred_element_type=jnp.float32)
        return y + b

    gelu = lambda v: 0.5 * v * (1.0 + lax.erf(v / jnp.sqrt(2.0)))
    for p in blocks:
        xn = ln(x, p["ln1_g"], p["ln1_b"])                    # (B, C, T)
        xt = jnp.swapaxes(xn, 1, 2)                           # (B, T, C)
        tm = lin(gelu(lin(xt, p["w1"], p["b1"])), p["w2"], p["b2"])
        x = x + p["a1"] * jnp.swapaxes(tm, 1, 2)
        xn2 = ln(x, p["ln2_g"], p["ln2_b"])
        cm = lin(gelu(lin(xn2, p["w3"], p["b3"])), p["w4"], p["b4"])
        x = x + p["a2"] * cm
    return x


if __name__ == "__main__":
    batch, channel, token, hidden, depth = 2, 4, 16, 32, 2

    root = jax.random.PRNGKey(0)
    kx, *kblocks = jax.random.split(root, depth + 1)
    x = jax.random.normal(kx, (batch, channel, token), jnp.float32)
    blocks = [init_block_params(k, token, channel, hidden) for k in kblocks]

    out = jax.block_until_ready(mixer_mlp_forward(x, pack_params(blocks)))

    ref = _reference_forward(x, blocks)
    assert out.shape == (batch, channel, token)
    assert jnp.allclose(out, ref, atol=2e-3, rtol=2e-3), (
        "mismatch vs pure-JAX reference: max |diff| = "
        f"{float(jnp.max(jnp.abs(out - ref)))}")
    print("KERNEL_OK")
</pallas_src>

<mosaic_0001>
module attributes {stable_mosaic.version = 11 : i64} {
  func.func @_mixer_kernel(%arg0: i32, %arg1: i32, %arg2: memref<2x4x16xf32, #tpu.memory_space<vmem>>, %arg3: memref<2x1x16xf32, #tpu.memory_space<vmem>>, %arg4: memref<2x1x16xf32, #tpu.memory_space<vmem>>, %arg5: memref<1x4x32xbf16, #tpu.memory_space<vmem>>, %arg6: memref<2x1x32xf32, #tpu.memory_space<vmem>>, %arg7: memref<1x32x4xbf16, #tpu.memory_space<vmem>>, %arg8: memref<2x1x4xf32, #tpu.memory_space<vmem>>, %arg9: memref<2x1x16xf32, #tpu.memory_space<vmem>>, %arg10: memref<2x1x16xf32, #tpu.memory_space<vmem>>, %arg11: memref<2x1x16xf32, #tpu.memory_space<vmem>>, %arg12: memref<1x16x32xbf16, #tpu.memory_space<vmem>>, %arg13: memref<2x1x32xf32, #tpu.memory_space<vmem>>, %arg14: memref<1x32x16xbf16, #tpu.memory_space<vmem>>, %arg15: memref<2x1x16xf32, #tpu.memory_space<vmem>>, %arg16: memref<2x1x16xf32, #tpu.memory_space<vmem>>, %arg17: memref<2x4x16xf32, #tpu.memory_space<vmem>>) attributes {dimension_semantics = [#tpu.dimension_semantics<parallel>, #tpu.dimension_semantics<arbitrary>], iteration_bounds = array<i64: 1, 2>, scalar_prefetch = 0 : i64, scratch_operands = 0 : i64, tpu.core_type = #tpu.core_type<tc>, window_params = [{transform_indices = @transform_0, window_bounds = array<i64: 2, 4, 16>}, {pipeline_mode = #tpu.pipeline_mode<synchronous>, transform_indices = @transform_1, window_bounds = array<i64: 2, 1, 16>}, {pipeline_mode = #tpu.pipeline_mode<synchronous>, transform_indices = @transform_2, window_bounds = array<i64: 2, 1, 16>}, {transform_indices = @transform_3, window_bounds = array<i64: 1, 4, 32>}, {pipeline_mode = #tpu.pipeline_mode<synchronous>, transform_indices = @transform_4, window_bounds = array<i64: 2, 1, 32>}, {transform_indices = @transform_5, window_bounds = array<i64: 1, 32, 4>}, {pipeline_mode = #tpu.pipeline_mode<synchronous>, transform_indices = @transform_6, window_bounds = array<i64: 2, 1, 4>}, {pipeline_mode = #tpu.pipeline_mode<synchronous>, transform_indices = @transform_7, window_bounds = array<i64: 2, 1, 16>}, {pipeline_mode = #tpu.pipeline_mode<synchronous>, transform_indices = @transform_8, window_bounds = array<i64: 2, 1, 16>}, {pipeline_mode = #tpu.pipeline_mode<synchronous>, transform_indices = @transform_9, window_bounds = array<i64: 2, 1, 16>}, {transform_indices = @transform_10, window_bounds = array<i64: 1, 16, 32>}, {pipeline_mode = #tpu.pipeline_mode<synchronous>, transform_indices = @transform_11, window_bounds = array<i64: 2, 1, 32>}, {transform_indices = @transform_12, window_bounds = array<i64: 1, 32, 16>}, {pipeline_mode = #tpu.pipeline_mode<synchronous>, transform_indices = @transform_13, window_bounds = array<i64: 2, 1, 16>}, {pipeline_mode = #tpu.pipeline_mode<synchronous>, transform_indices = @transform_14, window_bounds = array<i64: 2, 1, 16>}, {transform_indices = @transform_15, window_bounds = array<i64: 2, 4, 16>}]} {
    %c0_i32 = arith.constant 0 : i32
    %0 = arith.cmpi eq, %arg1, %c0_i32 : i32
    %1 = arith.extui %0 : i1 to i32
    %c0_i32_0 = arith.constant 0 : i32
    %2 = arith.cmpi ne, %1, %c0_i32_0 : i32
    scf.if %2 {
      %c0_59 = arith.constant 0 : index
      %c0_60 = arith.constant 0 : index
      %c0_61 = arith.constant 0 : index
      %137 = vector.load %arg2[%c0_59, %c0_60, %c0_61] : memref<2x4x16xf32, #tpu.memory_space<vmem>>, vector<2x4x16xf32>
      %c0_62 = arith.constant 0 : index
      %c0_63 = arith.constant 0 : index
      %c0_64 = arith.constant 0 : index
      %138 = vector.load %arg17[%c0_62, %c0_63, %c0_64] : memref<2x4x16xf32, #tpu.memory_space<vmem>>, vector<2x4x16xf32>
      tpu.vector_store %arg17[%c0_62, %c0_63, %c0_64], %137 {strides = array<i32>} : memref<2x4x16xf32, #tpu.memory_space<vmem>>, vector<2x4x16xf32>,
    } else {
    }
    %c0 = arith.constant 0 : index
    %c0_1 = arith.constant 0 : index
    %c0_2 = arith.constant 0 : index
    %3 = vector.load %arg17[%c0, %c0_1, %c0_2] : memref<2x4x16xf32, #tpu.memory_space<vmem>>, vector<2x4x16xf32>
    %4 = arith.index_cast %arg1 : i32 to index
    %c0_3 = arith.constant 0 : index
    %c0_4 = arith.constant 0 : index
    %5 = vector.load %arg3[%4, %c0_3, %c0_4] : memref<2x1x16xf32, #tpu.memory_space<vmem>>, vector<1x1x16xf32>
    %6 = vector.shape_cast %5 : vector<1x1x16xf32> to vector<1x16xf32>
    %7 = arith.index_cast %arg1 : i32 to index
    %c0_5 = arith.constant 0 : index
    %c0_6 = arith.constant 0 : index
    %8 = vector.load %arg4[%7, %c0_5, %c0_6] : memref<2x1x16xf32, #tpu.memory_space<vmem>>, vector<1x1x16xf32>
    %9 = vector.shape_cast %8 : vector<1x1x16xf32> to vector<1x16xf32>
    %cst = arith.constant dense<0.000000e+00> : vector<2x4xf32>
    %10 = vector.multi_reduction <add>, %3, %cst [2] : vector<2x4x16xf32> to vector<2x4xf32>
    %11 = vector.shape_cast %10 : vector<2x4xf32> to vector<2x4x1xf32>
    %cst_7 = arith.constant 1.600000e+01 : f32
    %12 = vector.broadcast %cst_7 : f32 to vector<2x4x1xf32>
    %13 = arith.divf %11, %12 : vector<2x4x1xf32>
    %14 = vector.broadcast %13 : vector<2x4x1xf32> to vector<2x4x16xf32>
    %15 = arith.subf %3, %14 : vector<2x4x16xf32>
    %16 = arith.mulf %15, %15 : vector<2x4x16xf32>
    %cst_8 = arith.constant dense<0.000000e+00> : vector<2x4xf32>
    %17 = vector.multi_reduction <add>, %16, %cst_8 [2] : vector<2x4x16xf32> to vector<2x4xf32>
    %18 = vector.shape_cast %17 : vector<2x4xf32> to vector<2x4x1xf32>
    %cst_9 = arith.constant 1.600000e+01 : f32
    %19 = vector.broadcast %cst_9 : f32 to vector<2x4x1xf32>
    %20 = arith.divf %18, %19 : vector<2x4x1xf32>
    %cst_10 = arith.constant 9.99999974E-6 : f32
    %21 = vector.broadcast %cst_10 : f32 to vector<2x4x1xf32>
    %22 = arith.addf %20, %21 : vector<2x4x1xf32>
    %23 = math.rsqrt %22 : vector<2x4x1xf32>
    %24 = vector.broadcast %23 : vector<2x4x1xf32> to vector<2x4x16xf32>
    %25 = arith.mulf %15, %24 : vector<2x4x16xf32>
    %26 = vector.shape_cast %6 : vector<1x16xf32> to vector<1x1x16xf32>
    %27 = vector.broadcast %26 : vector<1x1x16xf32> to vector<2x4x16xf32>
    %28 = arith.mulf %25, %27 : vector<2x4x16xf32>
    %29 = vector.shape_cast %9 : vector<1x16xf32> to vector<1x1x16xf32>
    %30 = vector.broadcast %29 : vector<1x1x16xf32> to vector<2x4x16xf32>
    %31 = arith.addf %28, %30 : vector<2x4x16xf32>
    %32 = tpu.transpose %31, [0, 2, 1] : vector<2x4x16xf32> -> vector<2x16x4xf32>
    %33 = vector.shape_cast %32 : vector<2x16x4xf32> to vector<32x4xf32>
    %34 = arith.truncf %33 : vector<32x4xf32> to vector<32x4xbf16>
    %35 = arith.index_cast %arg1 : i32 to index
    %c0_11 = arith.constant 0 : index
    %c0_12 = arith.constant 0 : index
    %36 = vector.load %arg6[%35, %c0_11, %c0_12] : memref<2x1x32xf32, #tpu.memory_space<vmem>>, vector<1x1x32xf32>
    %37 = vector.shape_cast %36 : vector<1x1x32xf32> to vector<1x32xf32>
    %38 = arith.index_cast %arg1 : i32 to index
    %c0_13 = arith.constant 0 : index
    %c0_14 = arith.constant 0 : index
    %39 = vector.load %arg8[%38, %c0_13, %c0_14] : memref<2x1x4xf32, #tpu.memory_space<vmem>>, vector<1x1x4xf32>
    %40 = vector.shape_cast %39 : vector<1x1x4xf32> to vector<1x4xf32>
    %cst_15 = arith.constant 0.000000e+00 : f32
    %41 = vector.broadcast %cst_15 : f32 to vector<32x4xf32>
    %c0_16 = arith.constant 0 : index
    %c0_17 = arith.constant 0 : index
    %c0_18 = arith.constant 0 : index
    %42 = vector.load %arg5[%c0_16, %c0_17, %c0_18] : memref<1x4x32xbf16, #tpu.memory_space<vmem>>, vector<1x4x32xbf16>
    %43 = vector.shape_cast %42 : vector<1x4x32xbf16> to vector<4x32xbf16>
    %cst_19 = arith.constant dense<0.000000e+00> : vector<32x32xf32>
    %44 = tpu.matmul %34, %43, %cst_19 {dimension_numbers = #tpu.dot_dimension_numbers<[1], [0], [0], [1], [0, 0, 1, 1], [], []>} : vector<32x4xbf16>, vector<4x32xbf16>, vector<32x32xf32> -> vector<32x32xf32>
    %45 = vector.broadcast %37 : vector<1x32xf32> to vector<32x32xf32>
    %46 = arith.addf %44, %45 : vector<32x32xf32>
    %cst_20 = arith.constant 5.000000e-01 : f32
    %47 = vector.broadcast %cst_20 : f32 to vector<32x32xf32>
    %48 = arith.mulf %47, %46 : vector<32x32xf32>
    %cst_21 = arith.constant 0.707106769 : f32
    %49 = vector.broadcast %cst_21 : f32 to vector<32x32xf32>
    %50 = arith.mulf %46, %49 : vector<32x32xf32>
    %51 = math.erf %50 : vector<32x32xf32>
    %cst_22 = arith.constant 1.000000e+00 : f32
    %52 = vector.broadcast %cst_22 : f32 to vector<32x32xf32>
    %53 = arith.addf %52, %51 : vector<32x32xf32>
    %54 = arith.mulf %48, %53 : vector<32x32xf32>
    %55 = arith.truncf %54 : vector<32x32xf32> to vector<32x32xbf16>
    %c0_23 = arith.constant 0 : index
    %c0_24 = arith.constant 0 : index
    %c0_25 = arith.constant 0 : index
    %56 = vector.load %arg7[%c0_23, %c0_24, %c0_25] : memref<1x32x4xbf16, #tpu.memory_space<vmem>>, vector<1x32x4xbf16>
    %57 = vector.shape_cast %56 : vector<1x32x4xbf16> to vector<32x4xbf16>
    %cst_26 = arith.constant dense<0.000000e+00> : vector<32x4xf32>
    %58 = tpu.matmul %55, %57, %cst_26 {dimension_numbers = #tpu.dot_dimension_numbers<[1], [0], [0], [1], [0, 0, 1, 1], [], []>} : vector<32x32xbf16>, vector<32x4xbf16>, vector<32x4xf32> -> vector<32x4xf32>
    %59 = arith.addf %41, %58 : vector<32x4xf32>
    %60 = vector.broadcast %40 : vector<1x4xf32> to vector<32x4xf32>
    %61 = arith.addf %59, %60 : vector<32x4xf32>
    %62 = arith.index_cast %arg1 : i32 to index
    %c0_27 = arith.constant 0 : index
    %c0_28 = arith.constant 0 : index
    %63 = vector.load %arg9[%62, %c0_27, %c0_28] : memref<2x1x16xf32, #tpu.memory_space<vmem>>, vector<1x1x16xf32>
    %64 = vector.shape_cast %63 : vector<1x1x16xf32> to vector<1x16xf32>
    %65 = vector.shape_cast %61 : vector<32x4xf32> to vector<2x16x4xf32>
    %66 = tpu.transpose %65, [0, 2, 1] : vector<2x16x4xf32> -> vector<2x4x16xf32>
    %67 = vector.shape_cast %64 : vector<1x16xf32> to vector<1x1x16xf32>
    %68 = vector.broadcast %67 : vector<1x1x16xf32> to vector<2x4x16xf32>
    %69 = arith.mulf %68, %66 : vector<2x4x16xf32>
    %70 = arith.addf %3, %69 : vector<2x4x16xf32>
    %71 = arith.index_cast %arg1 : i32 to index
    %c0_29 = arith.constant 0 : index
    %c0_30 = arith.constant 0 : index
    %72 = vector.load %arg10[%71, %c0_29, %c0_30] : memref<2x1x16xf32, #tpu.memory_space<vmem>>, vector<1x1x16xf32>
    %73 = vector.shape_cast %72 : vector<1x1x16xf32> to vector<1x16xf32>
    %74 = arith.index_cast %arg1 : i32 to index
    %c0_31 = arith.constant 0 : index
    %c0_32 = arith.constant 0 : index
    %75 = vector.load %arg11[%74, %c0_31, %c0_32] : memref<2x1x16xf32, #tpu.memory_space<vmem>>, vector<1x1x16xf32>
    %76 = vector.shape_cast %75 : vector<1x1x16xf32> to vector<1x16xf32>
    %cst_33 = arith.constant dense<0.000000e+00> : vector<2x4xf32>
    %77 = vector.multi_reduction <add>, %70, %cst_33 [2] : vector<2x4x16xf32> to vector<2x4xf32>
    %78 = vector.shape_cast %77 : vector<2x4xf32> to vector<2x4x1xf32>
    %cst_34 = arith.constant 1.600000e+01 : f32
    %79 = vector.broadcast %cst_34 : f32 to vector<2x4x1xf32>
    %80 = arith.divf %78, %79 : vector<2x4x1xf32>
    %81 = vector.broadcast %80 : vector<2x4x1xf32> to vector<2x4x16xf32>
    %82 = arith.subf %70, %81 : vector<2x4x16xf32>
    %83 = arith.mulf %82, %82 : vector<2x4x16xf32>
    %cst_35 = arith.constant dense<0.000000e+00> : vector<2x4xf32>
    %84 = vector.multi_reduction <add>, %83, %cst_35 [2] : vector<2x4x16xf32> to vector<2x4xf32>
    %85 = vector.shape_cast %84 : vector<2x4xf32> to vector<2x4x1xf32>
    %cst_36 = arith.constant 1.600000e+01 : f32
    %86 = vector.broadcast %cst_36 : f32 to vector<2x4x1xf32>
    %87 = arith.divf %85, %86 : vector<2x4x1xf32>
    %cst_37 = arith.constant 9.99999974E-6 : f32
    %88 = vector.broadcast %cst_37 : f32 to vector<2x4x1xf32>
    %89 = arith.addf %87, %88 : vector<2x4x1xf32>
    %90 = math.rsqrt %89 : vector<2x4x1xf32>
    %91 = vector.broadcast %90 : vector<2x4x1xf32> to vector<2x4x16xf32>
    %92 = arith.mulf %82, %91 : vector<2x4x16xf32>
    %93 = vector.shape_cast %73 : vector<1x16xf32> to vector<1x1x16xf32>
    %94 = vector.broadcast %93 : vector<1x1x16xf32> to vector<2x4x16xf32>
    %95 = arith.mulf %92, %94 : vector<2x4x16xf32>
    %96 = vector.shape_cast %76 : vector<1x16xf32> to vector<1x1x16xf32>
    %97 = vector.broadcast %96 : vector<1x1x16xf32> to vector<2x4x16xf32>
    %98 = arith.addf %95, %97 : vector<2x4x16xf32>
    %99 = vector.shape_cast %98 : vector<2x4x16xf32> to vector<8x16xf32>
    %100 = arith.truncf %99 : vector<8x16xf32> to vector<8x16xbf16>
    %101 = arith.index_cast %arg1 : i32 to index
    %c0_38 = arith.constant 0 : index
    %c0_39 = arith.constant 0 : index
    %102 = vector.load %arg13[%101, %c0_38, %c0_39] : memref<2x1x32xf32, #tpu.memory_space<vmem>>, vector<1x1x32xf32>
    %103 = vector.shape_cast %102 : vector<1x1x32xf32> to vector<1x32xf32>
    %104 = arith.index_cast %arg1 : i32 to index
    %c0_40 = arith.constant 0 : index
    %c0_41 = arith.constant 0 : index
    %105 = vector.load %arg15[%104, %c0_40, %c0_41] : memref<2x1x16xf32, #tpu.memory_space<vmem>>, vector<1x1x16xf32>
    %106 = vector.shape_cast %105 : vector<1x1x16xf32> to vector<1x16xf32>
    %cst_42 = arith.constant 0.000000e+00 : f32
    %107 = vector.broadcast %cst_42 : f32 to vector<8x16xf32>
    %c0_43 = arith.constant 0 : index
    %c0_44 = arith.constant 0 : index
    %c0_45 = arith.constant 0 : index
    %108 = vector.load %arg12[%c0_43, %c0_44, %c0_45] : memref<1x16x32xbf16, #tpu.memory_space<vmem>>, vector<1x16x32xbf16>
    %109 = vector.shape_cast %108 : vector<1x16x32xbf16> to vector<16x32xbf16>
    %cst_46 = arith.constant dense<0.000000e+00> : vector<8x32xf32>
    %110 = tpu.matmul %100, %109, %cst_46 {dimension_numbers = #tpu.dot_dimension_numbers<[1], [0], [0], [1], [0, 0, 1, 1], [], []>} : vector<8x16xbf16>, vector<16x32xbf16>, vector<8x32xf32> -> vector<8x32xf32>
    %111 = vector.broadcast %103 : vector<1x32xf32> to vector<8x32xf32>
    %112 = arith.addf %110, %111 : vector<8x32xf32>
    %cst_47 = arith.constant 5.000000e-01 : f32
    %113 = vector.broadcast %cst_47 : f32 to vector<8x32xf32>
    %114 = arith.mulf %113, %112 : vector<8x32xf32>
    %cst_48 = arith.constant 0.707106769 : f32
    %115 = vector.broadcast %cst_48 : f32 to vector<8x32xf32>
    %116 = arith.mulf %112, %115 : vector<8x32xf32>
    %117 = math.erf %116 : vector<8x32xf32>
    %cst_49 = arith.constant 1.000000e+00 : f32
    %118 = vector.broadcast %cst_49 : f32 to vector<8x32xf32>
    %119 = arith.addf %118, %117 : vector<8x32xf32>
    %120 = arith.mulf %114, %119 : vector<8x32xf32>
    %121 = arith.truncf %120 : vector<8x32xf32> to vector<8x32xbf16>
    %c0_50 = arith.constant 0 : index
    %c0_51 = arith.constant 0 : index
    %c0_52 = arith.constant 0 : index
    %122 = vector.load %arg14[%c0_50, %c0_51, %c0_52] : memref<1x32x16xbf16, #tpu.memory_space<vmem>>, vector<1x32x16xbf16>
    %123 = vector.shape_cast %122 : vector<1x32x16xbf16> to vector<32x16xbf16>
    %cst_53 = arith.constant dense<0.000000e+00> : vector<8x16xf32>
    %124 = tpu.matmul %121, %123, %cst_53 {dimension_numbers = #tpu.dot_dimension_numbers<[1], [0], [0], [1], [0, 0, 1, 1], [], []>} : vector<8x32xbf16>, vector<32x16xbf16>, vector<8x16xf32> -> vector<8x16xf32>
    %125 = arith.addf %107, %124 : vector<8x16xf32>
    %126 = vector.broadcast %106 : vector<1x16xf32> to vector<8x16xf32>
    %127 = arith.addf %125, %126 : vector<8x16xf32>
    %128 = arith.index_cast %arg1 : i32 to index
    %c0_54 = arith.constant 0 : index
    %c0_55 = arith.constant 0 : index
    %129 = vector.load %arg16[%128, %c0_54, %c0_55] : memref<2x1x16xf32, #tpu.memory_space<vmem>>, vector<1x1x16xf32>
    %130 = vector.shape_cast %129 : vector<1x1x16xf32> to vector<1x16xf32>
    %131 = vector.shape_cast %127 : vector<8x16xf32> to vector<2x4x16xf32>
    %132 = vector.shape_cast %130 : vector<1x16xf32> to vector<1x1x16xf32>
    %133 = vector.broadcast %132 : vector<1x1x16xf32> to vector<2x4x16xf32>
    %134 = arith.mulf %133, %131 : vector<2x4x16xf32>
    %135 = arith.addf %70, %134 : vector<2x4x16xf32>
    %c0_56 = arith.constant 0 : index
    %c0_57 = arith.constant 0 : index
    %c0_58 = arith.constant 0 : index
    %136 = vector.load %arg17[%c0_56, %c0_57, %c0_58] : memref<2x4x16xf32, #tpu.memory_space<vmem>>, vector<2x4x16xf32>
    tpu.vector_store %arg17[%c0_56, %c0_57, %c0_58], %135 {strides = array<i32>} : memref<2x4x16xf32, #tpu.memory_space<vmem>>, vector<2x4x16xf32>,
    return
  }
  func.func @transform_0(%arg0: i32, %arg1: i32) -> (i32, i32, i32) {
    %c0_i32 = arith.constant 0 : i32
    %c0_i32_0 = arith.constant 0 : i32
    %c0_i32_1 = arith.constant 0 : i32
    return %arg0, %c0_i32, %c0_i32_0 : i32, i32, i32
  }
  func.func @transform_1(%arg0: i32, %arg1: i32) -> (i32, i32, i32) {
    %c0_i32 = arith.constant 0 : i32
    %c0_i32_0 = arith.constant 0 : i32
    %c0_i32_1 = arith.constant 0 : i32
    %c0_i32_2 = arith.constant 0 : i32
    return %c0_i32, %c0_i32_0, %c0_i32_1 : i32, i32, i32
  }
  func.func @transform_2(%arg0: i32, %arg1: i32) -> (i32, i32, i32) {
    %c0_i32 = arith.constant 0 : i32
    %c0_i32_0 = arith.constant 0 : i32
    %c0_i32_1 = arith.constant 0 : i32
    %c0_i32_2 = arith.constant 0 : i32
    return %c0_i32, %c0_i32_0, %c0_i32_1 : i32, i32, i32
  }
  func.func @transform_3(%arg0: i32, %arg1: i32) -> (i32, i32, i32) {
    %c0_i32 = arith.constant 0 : i32
    %c0_i32_0 = arith.constant 0 : i32
    %c0_i32_1 = arith.constant 0 : i32
    return %arg1, %c0_i32, %c0_i32_0 : i32, i32, i32
  }
  func.func @transform_4(%arg0: i32, %arg1: i32) -> (i32, i32, i32) {
    %c0_i32 = arith.constant 0 : i32
    %c0_i32_0 = arith.constant 0 : i32
    %c0_i32_1 = arith.constant 0 : i32
    %c0_i32_2 = arith.constant 0 : i32
    return %c0_i32, %c0_i32_0, %c0_i32_1 : i32, i32, i32
  }
  func.func @transform_5(%arg0: i32, %arg1: i32) -> (i32, i32, i32) {
    %c0_i32 = arith.constant 0 : i32
    %c0_i32_0 = arith.constant 0 : i32
    %c0_i32_1 = arith.constant 0 : i32
    return %arg1, %c0_i32, %c0_i32_0 : i32, i32, i32
  }
  func.func @transform_6(%arg0: i32, %arg1: i32) -> (i32, i32, i32) {
    %c0_i32 = arith.constant 0 : i32
    %c0_i32_0 = arith.constant 0 : i32
    %c0_i32_1 = arith.constant 0 : i32
    %c0_i32_2 = arith.constant 0 : i32
    return %c0_i32, %c0_i32_0, %c0_i32_1 : i32, i32, i32
  }
  func.func @transform_7(%arg0: i32, %arg1: i32) -> (i32, i32, i32) {
    %c0_i32 = arith.constant 0 : i32
    %c0_i32_0 = arith.constant 0 : i32
    %c0_i32_1 = arith.constant 0 : i32
    %c0_i32_2 = arith.constant 0 : i32
    return %c0_i32, %c0_i32_0, %c0_i32_1 : i32, i32, i32
  }
  func.func @transform_8(%arg0: i32, %arg1: i32) -> (i32, i32, i32) {
    %c0_i32 = arith.constant 0 : i32
    %c0_i32_0 = arith.constant 0 : i32
    %c0_i32_1 = arith.constant 0 : i32
    %c0_i32_2 = arith.constant 0 : i32
    return %c0_i32, %c0_i32_0, %c0_i32_1 : i32, i32, i32
  }
  func.func @transform_9(%arg0: i32, %arg1: i32) -> (i32, i32, i32) {
    %c0_i32 = arith.constant 0 : i32
    %c0_i32_0 = arith.constant 0 : i32
    %c0_i32_1 = arith.constant 0 : i32
    %c0_i32_2 = arith.constant 0 : i32
    return %c0_i32, %c0_i32_0, %c0_i32_1 : i32, i32, i32
  }
  func.func @transform_10(%arg0: i32, %arg1: i32) -> (i32, i32, i32) {
    %c0_i32 = arith.constant 0 : i32
    %c0_i32_0 = arith.constant 0 : i32
    %c0_i32_1 = arith.constant 0 : i32
    return %arg1, %c0_i32, %c0_i32_0 : i32, i32, i32
  }
  func.func @transform_11(%arg0: i32, %arg1: i32) -> (i32, i32, i32) {
    %c0_i32 = arith.constant 0 : i32
    %c0_i32_0 = arith.constant 0 : i32
    %c0_i32_1 = arith.constant 0 : i32
    %c0_i32_2 = arith.constant 0 : i32
    return %c0_i32, %c0_i32_0, %c0_i32_1 : i32, i32, i32
  }
  func.func @transform_12(%arg0: i32, %arg1: i32) -> (i32, i32, i32) {
    %c0_i32 = arith.constant 0 : i32
    %c0_i32_0 = arith.constant 0 : i32
    %c0_i32_1 = arith.constant 0 : i32
    return %arg1, %c0_i32, %c0_i32_0 : i32, i32, i32
  }
  func.func @transform_13(%arg0: i32, %arg1: i32) -> (i32, i32, i32) {
    %c0_i32 = arith.constant 0 : i32
    %c0_i32_0 = arith.constant 0 : i32
    %c0_i32_1 = arith.constant 0 : i32
    %c0_i32_2 = arith.constant 0 : i32
    return %c0_i32, %c0_i32_0, %c0_i32_1 : i32, i32, i32
  }
  func.func @transform_14(%arg0: i32, %arg1: i32) -> (i32, i32, i32) {
    %c0_i32 = arith.constant 0 : i32
    %c0_i32_0 = arith.constant 0 : i32
    %c0_i32_1 = arith.constant 0 : i32
    %c0_i32_2 = arith.constant 0 : i32
    return %c0_i32, %c0_i32_0, %c0_i32_1 : i32, i32, i32
  }
  func.func @transform_15(%arg0: i32, %arg1: i32) -> (i32, i32, i32) {
    %c0_i32 = arith.constant 0 : i32
    %c0_i32_0 = arith.constant 0 : i32
    %c0_i32_1 = arith.constant 0 : i32
    return %arg0, %c0_i32, %c0_i32_0 : i32, i32, i32
  }
}

</mosaic_0001>

<bundles_post_ra>
// kernel: tpu_custom_call.1
= control target key start
LH: loop header
LB: loop body
LE: loop exit
PB: predicated region body
PF: predicated region fallthrough
CT: control target
= control target key end

     0   :  { %s1732_s0 = inlined_call_operand.vmem [shape: f32[2,4,16], index: 0, kind: input, shape index: {}]   ;;  %s1733_s1 = inlined_call_operand.vmem [shape: f32[2,1,16], index: 1, kind: input, shape index: {}]   ;;  %s1734_s2 = inlined_call_operand.vmem [shape: f32[2,1,16], index: 2, kind: input, shape index: {}]   ;;  %s1735_s3 = inlined_call_operand.vmem [shape: bf16[2,4,32], index: 3, kind: input, shape index: {}]   ;;  %s1736_s4 = inlined_call_operand.vmem [shape: f32[2,1,32], index: 4, kind: input, shape index: {}]   ;;  %s1737_s5 = inlined_call_operand.vmem [shape: bf16[2,32,4], index: 5, kind: input, shape index: {}]   ;;  %s1738_s6 = inlined_call_operand.vmem [shape: f32[2,1,4], index: 6, kind: input, shape index: {}]   ;;  %s1739_s7 = inlined_call_operand.vmem [shape: f32[2,1,16], index: 7, kind: input, shape index: {}]   ;;  %s1740_s8 = inlined_call_operand.vmem [shape: f32[2,1,16], index: 8, kind: input, shape index: {}]   ;;  %s1741_s9 = inlined_call_operand.vmem [shape: f32[2,1,16], index: 9, kind: input, shape index: {}]   ;;  %s1742_s10 = inlined_call_operand.vmem [shape: bf16[2,16,32], index: 10, kind: input, shape index: {}]   ;;  %s1743_s11 = inlined_call_operand.vmem [shape: f32[2,1,32], index: 11, kind: input, shape index: {}]   ;;  %s1744_s12 = inlined_call_operand.vmem [shape: bf16[2,32,16], index: 12, kind: input, shape index: {}]   ;;  %s1745_s13 = inlined_call_operand.vmem [shape: f32[2,1,16], index: 13, kind: input, shape index: {}]   ;;  %s1746_s14 = inlined_call_operand.vmem [shape: f32[2,1,16], index: 14, kind: input, shape index: {}]   ;;  %s1747_s15 = inlined_call_operand.hbm [shape: f32[2,4,16], index: 15, kind: output, shape index: {}]  }
   0x1   :  { %1751 = sst [smem:[#allocation8_spill]] %s1746_s14 }
   0x2   :  { %1752 = sst [smem:[#allocation9_spill]] %s1747_s15 }
   0x3   :  { %20 = vsyncpa [#allocation3], 0  ;;  %s1566_s18 = smov 0   ;;  %s1568_s19 = smov 0  }
   0x4   :  { %s1570_s20 = smov 0  }
   0x5 LB: > { %1753 = sst [smem:[#allocation5_spill]] %s1475_s19  ;;  %s35_s22 = sadd.s32 1, %s1475_s19  ;;  %s1479_s20 = sphi %s1570_s20, %s26_s20   ;;  %s1475_s19 = sphi %s1568_s19, %s1763_s19   ;;  %s1471_s18 = sphi %s1566_s18, %s1762_s18  }
   0x6   : > { %1754 = sst [smem:[#allocation6_spill]] %s1479_s20  ;;  %p36_p0 = scmp.ge.s32.totalorder %s35_s22, 2 }
   0x7   : > { %p1279_p1 = scmp.ge.s32.totalorder %s1479_s20, 1  ;;  %p490_p2 = scmp.lt.s32.totalorder %s1479_s20, 3 }
   0x8   : > { %s1765_s22 = smov (%p36_p0, %s35_s22), 0 }
   0x9   : > { %1755 = sst [smem:[#allocation7_spill]] %s1765_s22  ;;  %p491_p3 = pnand %p1279_p1, %p490_p2 }
   0xa   : > { %p558_p4 = scmp.lt.s32.totalorder (!%p491_p3), %s1471_s18, 1  ;;  %p1287_p5 = scmp.ne.s32.totalorder (!%p491_p3), %s1471_s18, 0 }
   0xb   : > { %494 = sbr.rel (%p491_p3) target bundleno = 1866 (0x74a), region = 80 }
  0x12   : > { %s559_s23 = scalar_select %p558_p4, %s1471_s18, 1 }
  0x13   : > { %582 = sbr.rel (%p1287_p5) target bundleno = 26 (0x1a), region = 84  ;;  %v583_v0 = vld [vmem:[%s1732_s0] sm:$0xf] (!%p1287_p5)  ;;  %vm585_vm0 = vcmask (!%p1287_p5), 125952   ;;  %v584_v1 = vld [vmem:[%s1732_s0 + $0x4] sm:$0xf] (!%p1287_p5) }
  0x14   : > { %s1280_s24 = sshll.u32 %s559_s23, 1  ;;  %s1313_s25 = sshll.u32 %s559_s23, 4  ;;  %586 = vst.msk [vmem:[#allocation2] sm:$0xf] (!%p1287_p5), %vm585_vm0, %v583_v0  ;;  %587 = vst.msk [vmem:[#allocation2 + $0x4] sm:$0xf] (!%p1287_p5), %vm585_vm0, %v584_v1 }
  0x15   : > { %s1592_s28 = scalar_lea.vmem %s1735_s3, %s1280_s24  ;;  %s1597_s16 = scalar_lea.vmem %s1737_s5, %s1313_s25 }
  0x16   : > { %s1314_s17 = sshll.u32 %s559_s23, 3  ;;  %s1602_s19 = scalar_lea.vmem %s1744_s12, %s1313_s25 }
  0x17   : > { %s1607_s20 = scalar_lea.vmem %s1742_s10, %s1314_s17 }
  0x1a PF: > { %vm594_vm1 = vcmask 125952   ;;  %s590_s21 = scalar_lea.vmem %s1733_s1, %s1471_s18  ;;  %s592_s29 = scalar_lea.vmem %s1734_s2, %s1471_s18  ;;  %v708_v33 = vld [vmem:[%s1592_s28] sm:$0x3]  ;;  %vm722_vm2 = vcmask 1041408   ;;  %vm715_vm3 = vcmask 31744   ;;  %v1405_v44 = vld [vmem:[%s1597_s16 + $0x8] sm:$0xff]  }
  0x1b   : > { %v1616_v2 = vld [vmem:[#allocation2] sm:$0xf]  ;;  %v1618_v3 = vld [vmem:[#allocation2 + $0x4] sm:$0xf]  ;;  %1356 = vmatprep.subr.msk.bf16.mxu0 %vm722_vm2, %v708_v33  ;;  %v724_v34 = vsel %vm722_vm2, %v708_v33, 0  ;;  %s704_s17 = scalar_lea.vmem %s1736_s4, %s1471_s18  ;;  %vm819_vm4 = vcmask 261120   ;;  %s706_s26 = scalar_lea.vmem %s1738_s6, %s1471_s18 }
  0x1c   : > { %v595_v4 = vsel %vm594_vm1, %v1616_v2, 0.0  ;;  %v598_v5 = vsel %vm594_vm1, %v1618_v3, 0.0  ;;  %v1288_v24 = vld [vmem:[%s590_s21] ss:$0 sm:$0xff]  ;;  %1329 = vmatpush3.bf16.msra.mxu0 %v724_v34  ;;  %s875_s14 = scalar_lea.vmem %s1739_s7, %s1471_s18  ;;  %vm1482_vm5 = vmmov 0   ;;  %vm1020_vm6 = vcmask 130048  }
  0x1d   : > { %596 = vadd.xlane.f32.xlu0 %v595_v4  ;;  %v1289_v28 = vld [vmem:[%s592_s29] ss:$0 sm:$0xff]  ;;  %s953_s29 = scalar_lea.vmem %s1741_s9, %s1471_s18  ;;  %s1756_s24 = sld [smem:[#allocation6_spill]] }
  0x1e   : > { %v1404_v43 = vld [vmem:[%s1597_s16] sm:$0xff]   ;;  %s1483_s21 = smov [#allocation2]  }
  0x1f   : > { %1334 = vmatprep.subr.bf16.mxu1 %v1404_v43  ;;  %v1290_v45 = vld [vmem:[%s704_s17] ss:$0 sm:$0xff]  ;;  %s1002_s17 = scalar_lea.vmem %s1743_s11, %s1471_s18 }
  0x20   : > { %1335 = vmatpush3.bf16.msra.mxu1 %v1404_v43 }
  0x21   : > { %599 = vadd.xlane.f32.xlu0 %v598_v5  ;;  %1336 = vmatprep.subr.bf16.mxu1 %v1405_v44 }
  0x23   : > { %s1758_s22 = sadd.s32 4294967295, %s1756_s24  }
  0x24   : > { %1337 = vmatpush3.bf16.msra.mxu1 %v1405_v44  ;;  %p1694_p6 = scmp.eq.s32.totalorder %s1758_s22, 1 }
  0xaa   : > { %v597_v6 = vpop.xlane.xlu0 %596 }
  0xab   : > { %v602_v7 = vmul.f32 0.0625, %v597_v6 }
  0xad   : > { %v604_v8 = vsub.f32 %v1616_v2, %v602_v7 }
  0xae   : > { %v600_v9 = vpop.xlane.xlu0 %599 }
  0xaf   : > { %v603_v10 = vmul.f32 0.0625, %v600_v9  ;;  %v606_v11 = vmul.f32 %v604_v8, %v604_v8 }
  0xb1   : > { %v605_v12 = vsub.f32 %v1618_v3, %v603_v10  ;;  %v608_v13 = vsel %vm594_vm1, %v606_v11, 0.0 }
  0xb2   : > { %609 = vadd.xlane.f32.xlu1 %v608_v13 }
  0xb3   : > { %v607_v14 = vmul.f32 %v605_v12, %v605_v12 }
  0xb5   : > { %v611_v15 = vsel %vm594_vm1, %v607_v14, 0.0  ;;  %v1293_v14 = vld [vmem:[%s706_s26] ss:$0 sm:$0xff]  ;;  %s1004_s26 = scalar_lea.vmem %s1745_s13, %s1471_s18 }
  0xb6   : > { %612 = vadd.xlane.f32.xlu1 %v611_v15 }
 0x13f   : > { %v610_v16 = vpop.xlane.xlu1 %609 }
 0x140   : > { %v614_v17 = vmul.f32 0.0625, %v610_v16 }
 0x142   : > { %v616_v18 = vadd.f32 1e-05, %v614_v17 }
 0x143   : > { %v613_v19 = vpop.xlane.xlu1 %612 }
 0x144   : > { %1409 = vrsqrt.f32 %v616_v18  ;;  %v615_v20 = vmul.f32 0.0625, %v613_v19 }
 0x146   : > { %v617_v21 = vadd.f32 1e-05, %v615_v20 }
 0x148   : > { %1411 = vrsqrt.f32 %v617_v21 }
 0x14e   : > { %v1410_v22 = vpop.eup %1409 }
 0x14f   : > { %v620_v23 = vmul.f32 %v1410_v22, %v604_v8 }
 0x151   : > { %v628_v27 = vmul.f32 %v1288_v24, %v620_v23  ;;  %v1298_v23 = vld [vmem:[%s875_s14] ss:$0 sm:$0xff]  ;;  %s1757_s14 = sld [smem:[#allocation8_spill]] }
 0x152   : > { %v1412_v25 = vpop.eup %1411 }
 0x153   : > { %v621_v26 = vmul.f32 %v1412_v25, %v605_v12  ;;  %v636_v30 = vadd.f32 %v1289_v28, %v628_v27 }
 0x155   : > { %v629_v29 = vmul.f32 %v1288_v24, %v621_v26 }
 0x157   : > { %v637_v31 = vadd.f32 %v1289_v28, %v629_v29  ;;  %s1135_s15 = scalar_lea.vmem %s1757_s14, %s1471_s18 }
 0x159   : > { %v1392_v32 = vpack.i.bf16 %v637_v31, %v636_v30 }
 0x15b   : > { %1393 = vxpose.xlu0.b32.start.end [1/1] (short) (narrow) %v1392_v32, 16 }
 0x1db   : > { %v1394_v35 = vpop.trf.xlu0 }
 0x1dc   : > { %v1398_v36 = vunpack.i.h.bf16 %v1394_v35  ;;  %v1395_v38 = vunpack.i.l.bf16 %v1394_v35 }
 0x1df   : > { %v1399_v37 = vpop.trf.xlu0 }
 0x1e0   : > { %v1403_v39 = vunpack.i.h.bf16 %v1399_v37  ;;  %v1400_v40 = vunpack.i.l.bf16 %v1399_v37 }
 0x1e2   : > { %v702_v41 = vpack.c.bf16 %v1400_v40, %v1395_v38  ;;  %v703_v42 = vpack.c.bf16 %v1403_v39, %v1398_v36  ;;  %v1406_v40 = vld [vmem:[%s1607_s20] sm:$0xff]   ;;  %s951_s20 = scalar_lea.vmem %s1740_s8, %s1471_s18 }
 0x1e4   : > { %1330 = vmatprep.mubr.msk.bf16.mxu0 %vm715_vm3, %v702_v41  ;;  %v1481_v41 = vmov 0.0  }
 0x1e5   : > { %1331 = vmatmul.mubr.msk.bf16.vlgmr.msra.gmra.mrb[0].mxu0 %vm715_vm3, %v703_v42  ;;  %1342 = vmatprep.subr.bf16.mxu0 %v1481_v41 }
 0x1e6   : > { %1344 = vmatprep.mubr.msk.bf16.mxu0 %vm1482_vm5, %v1481_v41  ;;  %1343 = vmatpush3.bf16.msra.mxu0 %v1406_v40 }
 0x1e7   : > { %1348 = vmatprep.subr.bf16.mxu1 %v1481_v41 }
 0x2b8   : > { %v1332_v46 = vpop.f32.mrb[0].mxu0 }
 0x2b9   : > { %v769_v47 = vadd.f32 %v1332_v46, %v1290_v45  ;;  %v760_v48 = vpop.f32.mrb[1].mxu0 }
 0x2ba   : > { %v761_v49 = vadd.f32 %v1290_v45, %v760_v48  ;;  %v1333_v50 = vpop.f32.mrb[2].mxu0 }
 0x2bb   : > { %v781_v51 = vmul.f32 0.70710677, %v769_v47  ;;  %v772_v52 = vadd.f32 %v1333_v50, %v1290_v45  ;;  %v763_v53 = vpop.f32.mrb[3].mxu0  ;;  %v777_v0 = vmul.f32 0.5, %v769_v47  ;;  %v1299_v50 = vld [vmem:[%s951_s20] ss:$0 sm:$0xff] }
 0x2bc   : > { %v779_v54 = vmul.f32 0.70710677, %v761_v49  ;;  %v764_v55 = vadd.f32 %v1290_v45, %v763_v53  ;;  %v775_v5 = vmul.f32 0.5, %v761_v49  ;;  %s1161_s20 = sshll.u32 %s1483_s21, 4  ;;  %s1162_s20 = int_to_ptr.vmem [resolvable:$true] %s1161_s20 }
 0x2bd   : > { %1413 = verf.f32 %v781_v51  ;;  %v782_v56 = vmul.f32 0.70710677, %v772_v52  ;;  %v778_v1 = vmul.f32 0.5, %v772_v52  ;;  %s1427_s18 = scalar_lea.vmem %s1162_s20, 128  ;;  %p1434_p10 = scmp.lt.s32.totalorder %s1162_s20, %s1162_s20 }
 0x2be   : > { %1415 = verf.f32 %v779_v54  ;;  %v780_v57 = vmul.f32 0.70710677, %v764_v55  ;;  %v776_v6 = vmul.f32 0.5, %v764_v55  ;;  %v1300_v54 = vld [vmem:[%s953_s29] ss:$0 sm:$0xff]  ;;  %p1428_p7 = scmp.ne.s32.totalorder %s1162_s20, %s1427_s18  ;;  %p1435_p11 = scmp.lt.s32.totalorder %s1427_s18, %s1427_s18 }
 0x2bf   : > { %1417 = verf.f32 %v782_v56 }
 0x2c0   : > { %1419 = verf.f32 %v780_v57  ;;  %p1429_p8 = pnand %p1428_p7, %p1694_p6  ;;  %p1436_p12 = por %p1435_p11, %p1434_p10 }
 0x2c2   : > { %p1430_p9 = pneg %p1429_p8 }
 0x2c4   : > { %p1437_p13 = pnand %p1436_p12, %p1430_p9 }
 0x2c7   : > { %v1414_v58 = vpop.eup %1413 }
 0x2c8   : > { %v1416_v59 = vpop.eup %1415  ;;  %v789_v60 = vadd.f32 1.0, %v1414_v58 }
 0x2c9   : > { %v1418_v61 = vpop.eup %1417  ;;  %v787_v62 = vadd.f32 1.0, %v1416_v59 }
 0x2ca   : > { %v1420_v63 = vpop.eup %1419  ;;  %v790_v4 = vadd.f32 1.0, %v1418_v61  ;;  %v793_v8 = vmul.f32 %v789_v60, %v777_v0  ;;  %v1407_v60 = vld [vmem:[%s1602_s19] sm:$0xff]   ;;  %v1408_v61 = vld [vmem:[%s1602_s19 + $0x8] sm:$0xff]  }
 0x2cb   : > { %v788_v7 = vadd.f32 1.0, %v1420_v63  ;;  %v791_v10 = vmul.f32 %v787_v62, %v775_v5  ;;  %v1301_v62 = vld [vmem:[%s1002_s17] ss:$0 sm:$0xff] }
 0x2cc   : > { %v794_v9 = vmul.f32 %v790_v4, %v778_v1 }
 0x2cd   : > { %v792_v11 = vmul.f32 %v788_v7, %v776_v6 }
 0x2ce   : > { %v796_v12 = vpack.c.bf16 %v794_v9, %v793_v8 }
 0x2cf   : > { %v795_v13 = vpack.c.bf16 %v792_v11, %v791_v10 }
 0x2d1   : > { %1338 = vmatprep.mubr.msk.bf16.mxu1 %vm819_vm4, %v795_v13 }
 0x2d2   : > { %1339 = vmatmul.mubr.msk.bf16.vlgmr.msra.gmra.mrb[0].mxu1 %vm819_vm4, %v796_v12  ;;  %v1304_v12 = vld [vmem:[%s1004_s26] ss:$0 sm:$0xff] }
 0x2d3   : > { %1352 = vmatprep.mubr.msk.bf16.mxu1 %vm1482_vm5, %v1481_v41  ;;  %1349 = vmatpush3.bf16.msra.mxu1 %v1407_v60 }
 0x2d4   : > { %1350 = vmatprep.subr.bf16.mxu1 %v1481_v41 }
 0x2d7   : > { %1351 = vmatpush3.bf16.msra.mxu1 %v1408_v61 }
 0x3a5   : > { %v1340_v15 = vpop.f32.mrb[0].mxu1 }
 0x3a6   : > { %v869_v16 = vadd.f32 %v1340_v15, %v1293_v14  ;;  %v860_v17 = vpop.f32.mrb[1].mxu1 }
 0x3a7   : > { %v861_v18 = vadd.f32 %v1293_v14, %v860_v17  ;;  %v1341_v19 = vpop.f32.mrb[2].mxu1 }
 0x3a8   : > { %909 = vxpose.xlu0.b32.start [1/2] (short) (narrow) %v869_v16, 8  ;;  %v863_v20 = vpop.f32.mrb[3].mxu1  ;;  %v872_v21 = vadd.f32 %v1341_v19, %v1293_v14 }
 0x3a9   : > { %877 = vxpose.xlu1.b32.start [1/2] (short) (narrow) %v861_v18, 8  ;;  %v864_v22 = vadd.f32 %v1293_v14, %v863_v20  ;;  %v1308_v14 = vld [vmem:[%s1135_s15] ss:$0 sm:$0xff] }
 0x3ac   : > { %910 = vxpose.xlu0.b32.end [2/2] (short) (narrow) %v872_v21, 8 }
 0x3ad   : > { %878 = vxpose.xlu1.b32.end [2/2] (short) (narrow) %v864_v22, 8 }
 0x428   : > { %v925_v24 = vpop.trf.xlu0 }
 0x429   : > { %v948_v25 = vmul.f32 %v1298_v23, %v925_v24  ;;  %v893_v26 = vpop.trf.xlu1 }
 0x42a   : > { %v947_v27 = vmul.f32 %v1298_v23, %v893_v26 }
 0x42b   : > { %v1654_v28 = vadd.f32 %v948_v25, %v1618_v3 }
 0x42c   : > { %v1657_v29 = vadd.f32 %v947_v27, %v1616_v2 }
 0x42d   : > { %v958_v30 = vsel %vm594_vm1, %v1654_v28, 0.0 }
 0x42e   : > { %959 = vadd.xlane.f32.xlu1 %v958_v30  ;;  %v955_v31 = vsel %vm594_vm1, %v1657_v29, 0.0 }
 0x42f   : > { %956 = vadd.xlane.f32.xlu0 %v955_v31 }
 0x4bb   : > { %v960_v32 = vpop.xlane.xlu1 %959 }
 0x4bc   : > { %v962_v33 = vmul.f32 0.0625, %v960_v32  ;;  %v957_v34 = vpop.xlane.xlu0 %956 }
 0x4bd   : > { %v961_v35 = vmul.f32 0.0625, %v957_v34 }
 0x4be   : > { %v964_v36 = vsub.f32 %v1654_v28, %v962_v33 }
 0x4bf   : > { %v963_v3 = vsub.f32 %v1657_v29, %v961_v35 }
 0x4c0   : > { %v966_v38 = vmul.f32 %v964_v36, %v964_v36 }
 0x4c1   : > { %v965_v37 = vmul.f32 %v963_v3, %v963_v3 }
 0x4c2   : > { %v970_v39 = vsel %vm594_vm1, %v966_v38, 0.0 }
 0x4c3   : > { %v967_v2 = vsel %vm594_vm1, %v965_v37, 0.0 }
 0x4c4   : > { %968 = vadd.xlane.f32.xlu1 %v967_v2 }
 0x4c8   : > { %971 = vadd.xlane.f32.xlu1 %v970_v39 }
 0x551   : > { %v969_v42 = vpop.xlane.xlu1 %968 }
 0x552   : > { %v973_v43 = vmul.f32 0.0625, %v969_v42 }
 0x554   : > { %v975_v44 = vadd.f32 1e-05, %v973_v43 }
 0x555   : > { %v972_v45 = vpop.xlane.xlu1 %971 }
 0x556   : > { %1421 = vrsqrt.f32 %v975_v44  ;;  %v974_v46 = vmul.f32 0.0625, %v972_v45 }
 0x558   : > { %v976_v47 = vadd.f32 1e-05, %v974_v46 }
 0x55a   : > { %1423 = vrsqrt.f32 %v976_v47 }
 0x560   : > { %v1422_v48 = vpop.eup %1421 }
 0x561   : > { %v979_v49 = vmul.f32 %v1422_v48, %v963_v3 }
 0x563   : > { %v987_v52 = vmul.f32 %v1299_v50, %v979_v49 }
 0x564   : > { %v1424_v51 = vpop.eup %1423 }
 0x565   : > { %v980_v53 = vmul.f32 %v1424_v51, %v964_v36  ;;  %v995_v56 = vadd.f32 %v1300_v54, %v987_v52 }
 0x567   : > { %v988_v55 = vmul.f32 %v1299_v50, %v980_v53 }
 0x569   : > { %v996_v57 = vadd.f32 %v1300_v54, %v988_v55 }
 0x56b   : > { %v999_v58 = vcombine.low %v995_v56, %v996_v57 }
 0x56d   : > { %v1001_v59 = vpack.c.bf16 %v999_v58, %v999_v58 }
 0x56f   : > { %1345 = vmatmul.mubr.msk.bf16.vlgmr.msra.gmra.mrb[4].mxu0 %vm1020_vm6, %v1001_v59 }
 0x642   : > { %v1058_v63 = vpop.f32.mrb[4].mxu0 }
 0x643   : > { %v1059_v0 = vadd.f32 %v1301_v62, %v1058_v63  ;;  %v1346_v1 = vpop.f32.mrb[5].mxu0 }
 0x644   : > { %v1061_v4 = vpop.f32.mrb[6].mxu0 }
 0x645   : > { %v1065_v5 = vmul.f32 0.70710677, %v1059_v0  ;;  %v1347_v6 = vpop.f32.mrb[7].mxu0  ;;  %v1064_v8 = vmul.f32 0.5, %v1059_v0 }
 0x647   : > { %1425 = verf.f32 %v1065_v5 }
 0x651   : > { %v1426_v7 = vpop.eup %1425 }
 0x652   : > { %v1067_v9 = vadd.f32 1.0, %v1426_v7 }
 0x654   : > { %v1068_v10 = vmul.f32 %v1067_v9, %v1064_v8 }
 0x656   : > { %v1069_v11 = vpack.c.bf16 %v1068_v10, %v1068_v10 }
 0x658   : > { %1353 = vmatmul.mubr.msk.bf16.vlgmr.msra.gmra.mrb[4].mxu1 %vm819_vm4, %v1069_v11 }
 0x72b   : > { %v1129_v13 = vpop.f32.mrb[4].mxu1 }
 0x72c   : > { %v1130_v15 = vadd.f32 %v1304_v12, %v1129_v13  ;;  %v1354_v16 = vpop.f32.mrb[5].mxu1 }
 0x72d   : > { %v1132_v17 = vpop.f32.mrb[6].mxu1 }
 0x72e   : > { %v1138_v18 = vcombine.high %v1130_v15, %v1130_v15  ;;  %v1146_v19 = vmul.f32 %v1308_v14, %v1130_v15  ;;  %v1355_v20 = vpop.f32.mrb[7].mxu1 }
 0x730   : > { %v1147_v21 = vmul.f32 %v1308_v14, %v1138_v18  ;;  %v1148_v22 = vadd.f32 %v1146_v19, %v1657_v29 }
 0x732   : > { %v1149_v23 = vadd.f32 %v1147_v21, %v1654_v28  ;;  %1150 = vst.msk [vmem:[#allocation2] sm:$0xf] %vm594_vm1, %v1148_v22 }
 0x734   : > { %1151 = vst.msk [vmem:[#allocation2 + $0x4] sm:$0xf] %vm594_vm1, %v1149_v23 }
 0x735   : > { %1440 = shalt.err (!%p1437_p13)
}
 0x736   : > { %s1760_s30 = sld [smem:[#allocation9_spill]] }
 0x73c   : > { %s1441_s17 = scalar_lea.hbm %s1760_s30, 128 }
 0x73d   : > { %p1442_p0 = scmp.ne.s32.totalorder %s1760_s30, %s1441_s17  ;;  %p1447_p3 = scmp.lt.u32.totalorder %s1441_s17, %s1760_s30 }
 0x73f   : > { %p1443_p1 = pnand %p1442_p0, %p1694_p6 }
 0x741   : > { %p1444_p2 = pneg %p1443_p1 }
 0x743   : > { %p1449_p4 = pnand %p1447_p3, %p1444_p2 }
 0x745   : > { %1452 = shalt.err (!%p1449_p4)
}
 0x746   : > { %s1484_s27 = smov 64   ;;  %s1485_s23 = smov 4  }
 0x747   : > { %1358 = dma.vmem_to_hbm [thread:$0]  (%p1694_p6), %s1162_s20, 128, %s1760_s30, [#allocation3], %s1484_s27, %s1484_s27, %s1485_s23  }
 0x748   : > { %1466 = dma.done.wait (%p1694_p6), [#allocation3], 128  }
 0x749   : > { %1468 = vsyncadd (%p1694_p6), [#allocation3], 4294967168 }
 0x74a PF: > { %s1761_s21 = sld [smem:[#allocation6_spill]]  ;;  %s1762_s18 = sld [smem:[#allocation5_spill]] }
 0x74b   : > { %s1763_s19 = sld [smem:[#allocation7_spill]] }
 0x750   : > { %s26_s20 = sadd.s32 1, %s1761_s21  }
 0x751   : > { %p23_p5 = scmp.ge.s32.totalorder %s26_s20, 4  }
 0x753   :  { %25 = sbr.rel (!%p23_p5) target bundleno = 5 (0x5), region = 134 }
 0x75a   :  { %1177 = vsyncpa [#allocation3], 1 }
 0x75b   :  { %1179 = vsyncpa [#allocation3 + $0x1], 1 }

</bundles_post_ra>
